<compile_context>
chip_gen: v7x
topology: tpu7x:2x2x1
jax: 0.10.0
libtpu: 0.0.40
codegen_flags: <defaults>
</compile_context>

<pallas_src>
import functools

import jax
import jax.numpy as jnp
from jax.experimental import pallas as pl
from jax.experimental.pallas import tpu as pltpu


def _round_up(x, m):
    return (x + m - 1) // m * m


def _cdiv(a, b):
    return (a + b - 1) // b


def _encoder_kernel(x_ref, y_ref, wx_ref, wc_ref, b_ref, out_ref, *, num_classes):
    # x_ref:   (tn, F)   compute dtype (streamed)
    # y_ref:   (tn, 1)   int32 masked labels; -1 => no onehot contribution
    # wx_ref:  (F, E)    compute dtype (resident)
    # wc_ref:  (C, E)    compute dtype (resident)
    # b_ref:   (1, E)    float32       (resident)
    # out_ref: (tn, E)   out dtype
    tn = x_ref.shape[0]

    labels = y_ref[...]                                            # (tn, 1)
    cls_ids = jax.lax.broadcasted_iota(jnp.int32, (tn, num_classes), 1)
    onehot = (labels == cls_ids).astype(x_ref.dtype)               # (tn, C)

    acc = jnp.dot(x_ref[...], wx_ref[...], preferred_element_type=jnp.float32)
    acc = acc + jnp.dot(onehot, wc_ref[...], preferred_element_type=jnp.float32)
    acc = acc + b_ref[...].astype(jnp.float32)                     # (1, E) broadcast
    out_ref[...] = acc.astype(out_ref.dtype)


def prepare_params(weight, bias, dim_in, dtype=None):
    """One-time conversion of torch Linear params (hoisted out of per-call path).

    weight: [E, F + C] (torch layout), bias: [E].
    Returns (wx [F, E], wc [C, E], bias_f32 [E]) in `dtype` (weights only).
    """
    w = jnp.asarray(weight)
    if dtype is not None:
        w = w.astype(dtype)
    wx = w[:, :dim_in].T
    wc = w[:, dim_in:].T
    return wx, wc, jnp.asarray(bias).astype(jnp.float32)


def _vmem_budget_bytes():
    try:
        cap = int(pltpu.get_tpu_info().vmem_capacity_bytes)
    except Exception:
        cap = 64 << 20          # conservative: v7x per-TC VMEM
    return max(24 << 20, min(int(cap * 0.7), 96 << 20))


def ogbn_arxiv_linear_node_encoder(x, y, train_mask, wx, wc, bias, *,
                                   num_classes, tile_n=4096,
                                   compute_dtype=None, out_dtype=None):
    """Fused (concat-onehot + Linear) forward.

    x: [N, F], y: [N, 1] int, train_mask: [N] bool,
    wx: [F, E], wc: [C, E] (pre-transposed), bias: [E].
    Returns (encoded_x [N, E], train_pred_mask [N]).
    """
    n, f = x.shape
    e = wx.shape[1]
    c = num_classes
    assert wc.shape == (c, e)

    compute_dtype = jnp.dtype(compute_dtype if compute_dtype is not None else x.dtype)
    out_dtype = jnp.dtype(out_dtype if out_dtype is not None else compute_dtype)
    in_b = compute_dtype.itemsize
    out_b = out_dtype.itemsize
    row_align = 16 if in_b < 4 else 8

    x_c = x if x.dtype == compute_dtype else x.astype(compute_dtype)
    wx_c = wx if wx.dtype == compute_dtype else wx.astype(compute_dtype)
    wc_c = wc if wc.dtype == compute_dtype else wc.astype(compute_dtype)
    b_c = jnp.asarray(bias, jnp.float32).reshape(1, e)

    # Fold train_mask into labels (masked rows get -1 -> zero onehot row).
    y_flat = jnp.asarray(y).astype(jnp.int32).reshape(n)
    masked_y = jnp.where(jnp.asarray(train_mask).reshape(n), y_flat,
                         jnp.int32(-1)).reshape(n, 1)

    # ---- tile sizing from explicit VMEM budget ------------------------------
    budget = _vmem_budget_bytes()
    e_acc = _round_up(e, 128)
    f_acc = _round_up(f, 128)
    c_acc = _round_up(c, 128)
    resident = 2 * (_round_up(f, 8) * e_acc * in_b          # Wx (double-buffered)
                    + _round_up(c, 8) * e_acc * in_b        # Wc
                    + 8 * e_acc * 4)                        # bias
    stream_row = f_acc * in_b + e_acc * out_b + 128 * 4     # x + out + padded label
    scratch_row = c_acc * in_b + e_acc * 4                  # onehot + f32 acc
    tile_max = max(row_align,
                   (budget - resident - (2 << 20)) // (2 * stream_row + scratch_row))

    tile = max(row_align, min(int(tile_n), int(tile_max)))
    tile = _round_up(tile, row_align)
    tile = min(tile, _round_up(n, row_align))
    # keep >=4 grid steps when possible (DMA/compute overlap, v7x megacore balance)
    if n > 4 * row_align and _cdiv(n, tile) < 4:
        tile = max(row_align, _round_up(_cdiv(n, 4), row_align))
    grid = _cdiv(n, tile)

    kernel = functools.partial(_encoder_kernel, num_classes=c)

    out = pl.pallas_call(
        kernel,
        out_shape=jax.ShapeDtypeStruct((n, e), out_dtype),
        grid_spec=pltpu.PrefetchScalarGridSpec(
            num_scalar_prefetch=0,
            grid=(grid,),
            in_specs=[
                pl.BlockSpec((tile, f), lambda i: (i, 0)),   # x tile (streamed)
                pl.BlockSpec((tile, 1), lambda i: (i, 0)),   # masked labels tile
                pl.BlockSpec((f, e), lambda i: (0, 0)),      # Wx (resident)
                pl.BlockSpec((c, e), lambda i: (0, 0)),      # Wc (resident)
                pl.BlockSpec((1, e), lambda i: (0, 0)),      # bias (resident)
            ],
            out_specs=pl.BlockSpec((tile, e), lambda i: (i, 0)),
        ),
        compiler_params=pltpu.CompilerParams(
            dimension_semantics=("parallel",),
            vmem_limit_bytes=int(budget)),
    )(x_c, masked_y, wx_c, wc_c, b_c)

    # eval path: train_pred_mask = train_mask (glue, no compute)
    return out, train_mask


def _reference(x, y, train_mask, weight, bias, num_classes):
    n = x.shape[0]
    onehot = jnp.zeros((n, num_classes), jnp.float32)
    rows = jnp.arange(n)
    cols = jnp.asarray(y).reshape(n)
    onehot = onehot.at[rows, cols].set(jnp.where(train_mask, 1.0, 0.0))
    xc = jnp.concatenate([x.astype(jnp.float32), onehot], axis=-1)
    return xc @ weight.T + bias


if __name__ == "__main__":
    key = jax.random.PRNGKey(0)
    k_x, k_y, k_m, k_w, k_b = jax.random.split(key, 5)

    F = 32          # raw node feature dim (cfg.share.dim_in)
    C = 8           # number of classes (cfg.share.dim_out)
    E = 32          # emb_dim

    fan_in = F + C
    bound = 1.0 / (fan_in ** 0.5)
    weight = jax.random.uniform(k_w, (E, fan_in), jnp.float32, -bound, bound)
    bias = jax.random.uniform(k_b, (E,), jnp.float32, -bound, bound)
    wx, wc, b = prepare_params(weight, bias, F)          # one-time split/transpose

    # --- check 1: even N, single tile, f32 -----------------------------------
    N = 16
    x = jax.random.normal(k_x, (N, F), jnp.float32)
    y = jax.random.randint(k_y, (N, 1), 0, C, jnp.int32)
    train_mask = jax.random.bernoulli(k_m, 0.5, (N,))
    out, pred_mask = ogbn_arxiv_linear_node_encoder(
        x, y, train_mask, wx, wc, b, num_classes=C)
    out = jax.block_until_ready(out)
    ref = _reference(x, y, train_mask, weight, bias, C)
    assert out.shape == (N, E)
    assert jnp.allclose(out, ref, atol=1e-5, rtol=1e-5), "f32 mismatch vs reference"
    assert bool(jnp.all(pred_mask == train_mask))

    # --- check 2: ragged N, multi-tile grid, f32 (no wrapper pad/slice) ------
    N2 = 19
    x2 = jax.random.normal(k_x, (N2, F), jnp.float32)
    y2 = jax.random.randint(k_y, (N2, 1), 0, C, jnp.int32)
    m2 = jax.random.bernoulli(k_m, 0.5, (N2,))
    out2, _ = ogbn_arxiv_linear_node_encoder(
        x2, y2, m2, wx, wc, b, num_classes=C, tile_n=8)
    out2 = jax.block_until_ready(out2)
    ref2 = _reference(x2, y2, m2, weight, bias, C)
    assert out2.shape == (N2, E)
    assert jnp.allclose(out2, ref2, atol=1e-5, rtol=1e-5), "ragged mismatch"

    # --- check 3: bf16 streaming with f32 accumulation -----------------------
    wx16, wc16, b16 = prepare_params(weight, bias, F, dtype=jnp.bfloat16)
    out16, _ = ogbn_arxiv_linear_node_encoder(
        x.astype(jnp.bfloat16), y, train_mask, wx16, wc16, b16,
        num_classes=C, compute_dtype=jnp.bfloat16, out_dtype=jnp.bfloat16)
    out16 = jax.block_until_ready(out16)
    assert out16.dtype == jnp.bfloat16
    assert jnp.allclose(out16.astype(jnp.float32), ref, atol=1e-1, rtol=5e-2), \
        "bf16 mismatch vs reference"

    print("KERNEL_OK")
</pallas_src>

<mosaic_0001>
module attributes {stable_mosaic.version = 11 : i64} {
  func.func @_encoder_kernel(%arg0: i32, %arg1: memref<16x32xf32, #tpu.memory_space<vmem>>, %arg2: memref<16x1xi32, #tpu.memory_space<vmem>>, %arg3: memref<32x32xf32, #tpu.memory_space<vmem>>, %arg4: memref<8x32xf32, #tpu.memory_space<vmem>>, %arg5: memref<1x32xf32, #tpu.memory_space<vmem>>, %arg6: memref<16x32xf32, #tpu.memory_space<vmem>>) attributes {dimension_semantics = [#tpu.dimension_semantics<parallel>], iteration_bounds = array<i64: 1>, scalar_prefetch = 0 : i64, scratch_operands = 0 : i64, tpu.core_type = #tpu.core_type<tc>, window_params = [{transform_indices = @transform_0, window_bounds = array<i64: 16, 32>}, {transform_indices = @transform_1, window_bounds = array<i64: 16, 1>}, {pipeline_mode = #tpu.pipeline_mode<synchronous>, transform_indices = @transform_2, window_bounds = array<i64: 32, 32>}, {pipeline_mode = #tpu.pipeline_mode<synchronous>, transform_indices = @transform_3, window_bounds = array<i64: 8, 32>}, {pipeline_mode = #tpu.pipeline_mode<synchronous>, transform_indices = @transform_4, window_bounds = array<i64: 1, 32>}, {transform_indices = @transform_5, window_bounds = array<i64: 16, 32>}]} {
    %c0 = arith.constant 0 : index
    %c0_0 = arith.constant 0 : index
    %0 = vector.load %arg2[%c0, %c0_0] : memref<16x1xi32, #tpu.memory_space<vmem>>, vector<16x1xi32>
    %1 = tpu.iota {dimensions = array<i32: 1>} : vector<16x8xi32>
    %2 = vector.broadcast %0 : vector<16x1xi32> to vector<16x8xi32>
    %3 = arith.cmpi eq, %2, %1 : vector<16x8xi32>
    %4 = arith.extui %3 : vector<16x8xi1> to vector<16x8xi32>
    %5 = arith.sitofp %4 : vector<16x8xi32> to vector<16x8xf32>
    %c0_1 = arith.constant 0 : index
    %c0_2 = arith.constant 0 : index
    %6 = vector.load %arg1[%c0_1, %c0_2] : memref<16x32xf32, #tpu.memory_space<vmem>>, vector<16x32xf32>
    %c0_3 = arith.constant 0 : index
    %c0_4 = arith.constant 0 : index
    %7 = vector.load %arg3[%c0_3, %c0_4] : memref<32x32xf32, #tpu.memory_space<vmem>>, vector<32x32xf32>
    %cst = arith.constant dense<0.000000e+00> : vector<16x32xf32>
    %8 = tpu.matmul %6, %7, %cst {dimension_numbers = #tpu.dot_dimension_numbers<[1], [0], [0], [1], [0, 0, 1, 1], [], []>} : vector<16x32xf32>, vector<32x32xf32>, vector<16x32xf32> -> vector<16x32xf32>
    %c0_5 = arith.constant 0 : index
    %c0_6 = arith.constant 0 : index
    %9 = vector.load %arg4[%c0_5, %c0_6] : memref<8x32xf32, #tpu.memory_space<vmem>>, vector<8x32xf32>
    %cst_7 = arith.constant dense<0.000000e+00> : vector<16x32xf32>
    %10 = tpu.matmul %5, %9, %cst_7 {dimension_numbers = #tpu.dot_dimension_numbers<[1], [0], [0], [1], [0, 0, 1, 1], [], []>} : vector<16x8xf32>, vector<8x32xf32>, vector<16x32xf32> -> vector<16x32xf32>
    %11 = arith.addf %8, %10 : vector<16x32xf32>
    %c0_8 = arith.constant 0 : index
    %c0_9 = arith.constant 0 : index
    %12 = vector.load %arg5[%c0_8, %c0_9] : memref<1x32xf32, #tpu.memory_space<vmem>>, vector<1x32xf32>
    %13 = vector.broadcast %12 : vector<1x32xf32> to vector<16x32xf32>
    %14 = arith.addf %11, %13 : vector<16x32xf32>
    %c0_10 = arith.constant 0 : index
    %c0_11 = arith.constant 0 : index
    %15 = vector.load %arg6[%c0_10, %c0_11] : memref<16x32xf32, #tpu.memory_space<vmem>>, vector<16x32xf32>
    tpu.vector_store %arg6[%c0_10, %c0_11], %14 {strides = array<i32>} : memref<16x32xf32, #tpu.memory_space<vmem>>, vector<16x32xf32>,
    return
  }
  func.func @transform_0(%arg0: i32) -> (i32, i32) {
    %c0_i32 = arith.constant 0 : i32
    %c0_i32_0 = arith.constant 0 : i32
    return %arg0, %c0_i32 : i32, i32
  }
  func.func @transform_1(%arg0: i32) -> (i32, i32) {
    %c0_i32 = arith.constant 0 : i32
    %c0_i32_0 = arith.constant 0 : i32
    return %arg0, %c0_i32 : i32, i32
  }
  func.func @transform_2(%arg0: i32) -> (i32, i32) {
    %c0_i32 = arith.constant 0 : i32
    %c0_i32_0 = arith.constant 0 : i32
    %c0_i32_1 = arith.constant 0 : i32
    return %c0_i32, %c0_i32_0 : i32, i32
  }
  func.func @transform_3(%arg0: i32) -> (i32, i32) {
    %c0_i32 = arith.constant 0 : i32
    %c0_i32_0 = arith.constant 0 : i32
    %c0_i32_1 = arith.constant 0 : i32
    return %c0_i32, %c0_i32_0 : i32, i32
  }
  func.func @transform_4(%arg0: i32) -> (i32, i32) {
    %c0_i32 = arith.constant 0 : i32
    %c0_i32_0 = arith.constant 0 : i32
    %c0_i32_1 = arith.constant 0 : i32
    return %c0_i32, %c0_i32_0 : i32, i32
  }
  func.func @transform_5(%arg0: i32) -> (i32, i32) {
    %c0_i32 = arith.constant 0 : i32
    %c0_i32_0 = arith.constant 0 : i32
    return %arg0, %c0_i32 : i32, i32
  }
}

</mosaic_0001>

<bundles_post_ra>
// kernel: tpu_custom_call.1
= control target key start
LH: loop header
LB: loop body
LE: loop exit
PB: predicated region body
PF: predicated region fallthrough
CT: control target
= control target key end

     0   :  { %10 = vsyncpa [#allocation3], 0  ;;  %s435_s0 = inlined_call_operand.vmem [shape: f32[16,32], index: 0, kind: input, shape index: {}]   ;;  %s436_s1 = inlined_call_operand.vmem [shape: s32[16,1], index: 1, kind: input, shape index: {}]   ;;  %s437_s2 = inlined_call_operand.hbm [shape: f32[32,32], index: 2, kind: input, shape index: {}]   ;;  %s438_s3 = inlined_call_operand.vmem [shape: f32[8,32], index: 3, kind: input, shape index: {}]   ;;  %s439_s4 = inlined_call_operand.vmem [shape: f32[1,32], index: 4, kind: input, shape index: {}]   ;;  %s440_s5 = inlined_call_operand.hbm [shape: f32[16,32], index: 5, kind: output, shape index: {}]  }
   0x1   :  { %11 = vsyncpa [#allocation4], 0  ;;  %s347_s18 = smov [#allocation2]   ;;  %s299_s22 = scalar_lea.hbm %s437_s2, 512 }
   0x2   :  { %s21_s19 = sshll.u32 %s347_s18, 4  ;;  %p300_p0 = scmp.ne.s32.totalorder %s437_s2, %s299_s22  ;;  %s22_s19 = int_to_ptr.vmem [resolvable:$true] %s21_s19 }
   0x3   :  { %p303_p1 = scmp.lt.u32.totalorder %s299_s22, %s437_s2 }
   0x5   :  { %p305_p2 = pnand %p303_p1, %p300_p0 }
   0x7   :  { %308 = shalt.err (!%p305_p2)
}
   0x8   :  { %s309_s27 = scalar_lea.vmem %s22_s19, 512  ;;  %p314_p4 = scmp.lt.s32.totalorder %s22_s19, %s22_s19 }
   0x9   :  { %p310_p3 = scmp.ne.s32.totalorder %s22_s19, %s309_s27  ;;  %p315_p5 = scmp.lt.s32.totalorder %s309_s27, %s309_s27 }
   0xb   :  { %p316_p6 = por %p315_p5, %p314_p4 }
   0xd   :  { %p317_p7 = pnand %p316_p6, %p310_p3 }
   0xf   :  { %320 = shalt.err (!%p317_p7)
}
  0x10   :  { %s348_s28 = smov 128   ;;  %s349_s29 = smov 8  }
  0x11   :  { %27 = dma.hbm_to_vmem [thread:$0]  %s437_s2, 512, %s22_s19, [#allocation3], %s348_s28, %s348_s28, %s349_s29  }
  0x12   :  { %343 = dma.done.wait [#allocation3], 512  }
  0x13   :  { %344 = vsyncadd [#allocation3], 4294966784  ;;  %v350_v0 = vmov 0   ;;  %v35_v1 = vld [vmem:[%s436_s1] sm:$0xff]  ;;  %v54_v3 = vld [vmem:[#allocation2 + $0x8] sm:$0xff]  ;;  %vm140_vm0 = vcmask 261120   ;;  %v37_v12 = vlaneseq }
  0x14   :  { %298 = vset.pattern.permute.xlu0 %v350_v0  ;;  %v53_v2 = vld [vmem:[#allocation2] sm:$0xff]  ;;  %v55_v4 = vld [vmem:[#allocation2 + $0x10] sm:$0xff]  ;;  %v56_v5 = vld [vmem:[#allocation2 + $0x18] sm:$0xff]  ;;  %vm58_vm1 = vcmask 64512   ;;  %v351_v15 = vmov 0.0  }
  0x15   :  { %40 = vperm.xlu0 %298, %v35_v1   ;;  %v36_v6 = vld [vmem:[%s436_s1 + $0x8] sm:$0xff]  ;;  %v282_v7 = vpack.c.bf16 %v54_v3, %v53_v2  ;;  %v286_v8 = vpack.c.bf16 %v56_v5, %v55_v4  ;;  %v57_v9 = vld [vmem:[%s438_s3] sm:$0xff]  ;;  %v38_v13 = vand.u32 127, %v37_v12 }
  0x16   :  { %v51_v10 = vld [vmem:[%s435_s0] sm:$0xff]  ;;  %266 = vmatprep.subr.mxu1 %v57_v9  ;;  %v52_v11 = vld [vmem:[%s435_s0 + $0x8] sm:$0xff]  ;;  %s352_s0 = smov [#allocation5]  }
  0x17   :  { %283 = vmatprep.subr.bf16.mxu0 %v282_v7  ;;  %279 = vmatprep.mubr.msk.f32.mxu0 %vm140_vm0, %v51_v10  ;;  %v256_v22 = vld [vmem:[%s439_s4] ss:$0 sm:$0xff]  ;;  %s238_s16 = sshll.u32 %s352_s0, 4  ;;  %s239_s16 = int_to_ptr.vmem [resolvable:$true] %s238_s16 }
  0x18   :  { %285 = vmatpush3.bf16.msra.mxu0 %v282_v7  ;;  %267 = vmatpush3.msra.mxu1 %v57_v9  ;;  %s321_s17 = scalar_lea.vmem %s239_s16, 256  ;;  %p326_p9 = scmp.lt.s32.totalorder %s239_s16, %s239_s16 }
  0x19   :  { %43 = vperm.xlu0 %298, %v36_v6   ;;  %287 = vmatprep.subr.bf16.mxu0 %v286_v8  ;;  %p322_p8 = scmp.ne.s32.totalorder %s239_s16, %s321_s17  ;;  %p327_p10 = scmp.lt.s32.totalorder %s321_s17, %s321_s17 }
  0x1b   :  { %p328_p11 = por %p327_p10, %p326_p9 }
  0x1c   :  { %289 = vmatpush3.bf16.msra.mxu0 %v286_v8 }
  0x1d   :  { %p329_p12 = pnand %p328_p11, %p322_p8 }
  0x1f   :  { %280 = vmatmul.mubr.msk.f32.vlgmr.msra.gmra.mrb[0].mxu0 %vm140_vm0, %v52_v11 }
  0x94   :  { %v41_v14 = vpop.permute.xlu0 %40 }
  0x95   :  { %vm45_vm2 = vcmp.eq.s32.totalorder %v41_v14, %v38_v13 }
  0x96   :  { %v250_v16 = vsel %vm45_vm2, 1.0, %v351_v15 }
  0x97   :  { %268 = vmatprep.mubr.msk.f32.mxu1 %vm58_vm1, %v250_v16 }
  0x98   :  { %v44_v17 = vpop.permute.xlu0 %43 }
  0x99   :  { %vm46_vm3 = vcmp.eq.s32.totalorder %v44_v17, %v38_v13 }
  0x9a   :  { %v251_v18 = vsel %vm46_vm3, 1.0, %v351_v15 }
  0x9b   :  { %269 = vmatmul.mubr.msk.f32.vlgmr.msra.gmra.mrb[0].mxu1 %vm58_vm1, %v251_v18 }
  0xf2   :  { %v281_v19 = vpop.f32.mrb[0].mxu0 }
  0xf3   :  { %v213_v20 = vpop.f32.mrb[1].mxu0 }
 0x16e   :  { %v270_v21 = vpop.f32.mrb[0].mxu1 }
 0x16f   :  { %v219_v23 = vadd.f32 %v281_v19, %v270_v21  ;;  %v131_v24 = vpop.f32.mrb[1].mxu1 }
 0x170   :  { %v214_v25 = vadd.f32 %v213_v20, %v131_v24 }
 0x171   :  { %v230_v26 = vadd.f32 %v256_v22, %v219_v23 }
 0x172   :  { %v229_v27 = vadd.f32 %v256_v22, %v214_v25 }
 0x173   :  { %232 = vst.msk [vmem:[#allocation5 + $0x8] sm:$0xff] %vm140_vm0, %v230_v26 }
 0x174   :  { %231 = vst.msk [vmem:[#allocation5] sm:$0xff] %vm140_vm0, %v229_v27 }
 0x175   :  { %332 = shalt.err (!%p329_p12)
}
 0x176   :  { %s333_s19 = scalar_lea.hbm %s440_s5, 256 }
 0x177   :  { %p334_p13 = scmp.ne.s32.totalorder %s440_s5, %s333_s19  ;;  %p337_p0 = scmp.lt.u32.totalorder %s333_s19, %s440_s5 }
 0x179   :  { %p339_p1 = pnand %p337_p0, %p334_p13 }
 0x17b   :  { %342 = shalt.err (!%p339_p1)
}
 0x17c   :  { %244 = dma.vmem_to_hbm [thread:$0]  %s239_s16, 256, %s440_s5, [#allocation4], %s348_s28, %s348_s28, %s349_s29  }
 0x17d   :  { %345 = dma.done.wait [#allocation4], 256  }
 0x17e   :  { %346 = vsyncadd [#allocation4], 4294967040 }
 0x17f   :  { %248 = vsyncpa [#allocation3], 1 }
 0x180   :  { %249 = vsyncpa [#allocation4], 1 }

</bundles_post_ra>
